<compile_context>
chip_gen: v6e
topology: v6e:2x2x1
jax: 0.10.0
libtpu: 0.0.40
codegen_flags: <defaults>
</compile_context>

<pallas_src>
import jax
import jax.numpy as jnp
from jax.experimental import pallas as pl
from jax.experimental.pallas import tpu as pltpu

N_FEATURES = 100
F_PAD = 128        # lane-aligned width used only inside the kernel (scratch + weight)
BN_EPS = 1e-5


def _fused_bn_linear_relu_kernel(x_ref, params_ref, wT_ref, o_ref, y_pad_ref):
    # x_ref:      (N, 100)   f32   input (unpadded, full-array block)
    # params_ref: (3, 100)   f32   rows: [gamma, beta, linear_bias]
    # wT_ref:     (128, 128) bf16  Linear weight, pre-transposed + zero-padded
    # o_ref:      (N, 100)   f32   output
    # y_pad_ref:  (N, 128)   f32   VMEM scratch: lane-padded normalized activations
    x = x_ref[...]
    n = x.shape[0]
    inv_n = 1.0 / n

    # Training-mode BatchNorm1d statistics (biased batch variance), one pass.
    s = jnp.sum(x, axis=0, keepdims=True)
    ss = jnp.sum(x * x, axis=0, keepdims=True)
    mean = s * inv_n
    var = jnp.maximum(ss * inv_n - mean * mean, 0.0)
    inv_std = jax.lax.rsqrt(var + BN_EPS)

    params = params_ref[...]
    gamma = params[0:1, :]
    beta = params[1:2, :]
    bias = params[2:3, :]

    # Fold BN affine into a single scale/shift:  y = x * scale + shift  (f32, VPU).
    scale = gamma * inv_std
    shift = beta - mean * scale

    # Lane-pad the normalized activations 100 -> 128 inside VMEM scratch so the
    # matmul is one clean 128x128 MXU tile; pad lanes stay exactly zero and the
    # padded weight rows are zero, so they contribute nothing.
    y_pad_ref[...] = jnp.zeros_like(y_pad_ref)
    y_pad_ref[:, 0:N_FEATURES] = x * scale + shift

    # Linear(100,100): bf16 operands on the MXU, f32 accumulation.
    z = jnp.dot(y_pad_ref[...].astype(jnp.bfloat16), wT_ref[...],
                preferred_element_type=jnp.float32)

    # Bias + ReLU, store directly at (N, 100).
    o_ref[...] = jnp.maximum(z[:, 0:N_FEATURES] + bias, 0.0).astype(o_ref.dtype)


def prepare_params(gamma, beta, weight, bias):
    """One-time parameter prep (hoisted out of the per-call path). Cache the result."""
    params = jnp.stack(
        [gamma.astype(jnp.float32), beta.astype(jnp.float32), bias.astype(jnp.float32)],
        axis=0,
    )  # (3, 100): [gamma, beta, linear_bias]
    pad = F_PAD - N_FEATURES
    # PyTorch weight is (out, in); transpose to (in, out) so y @ wT == y @ W.T,
    # zero-pad both dims to 128, cast to bf16 for the MXU.
    wT = jnp.pad(jnp.transpose(weight).astype(jnp.float32), ((0, pad), (0, pad)))
    wT = wT.astype(jnp.bfloat16)  # (128, 128)
    return params, wT


@jax.jit
def model_forward(x, params, wT):
    """x: (N, 100) float32; params/wT already prepared via prepare_params()."""
    n = x.shape[0]
    vmem = pl.BlockSpec(memory_space=pltpu.MemorySpace.VMEM)
    return pl.pallas_call(
        _fused_bn_linear_relu_kernel,
        out_shape=jax.ShapeDtypeStruct((n, N_FEATURES), jnp.float32),
        in_specs=[vmem, vmem, vmem],
        out_specs=vmem,
        scratch_shapes=[pltpu.VMEM((n, F_PAD), jnp.float32)],
    )(x.astype(jnp.float32), params, wT)
    # TODO(synk): if N grows into the thousands, switch to a gridded two-pass BN
    # (pass 1: per-tile sum/sum-sq reduction; pass 2: normalize + matmul) with
    # 1024-2048-row tiles, batch axis marked "parallel" (2 TCs on v7x), and
    # vmem_limit_bytes sized for v7x's 64 MiB VMEM.


if __name__ == "__main__":
    key = jax.random.PRNGKey(0)
    k_x, k_w, k_b = jax.random.split(key, 3)

    N = 8  # batch size (BatchNorm1d needs a batch dimension)
    x = jax.random.normal(k_x, (N, N_FEATURES), dtype=jnp.float32)

    # BatchNorm1d(100) default affine init: weight=1, bias=0.
    gamma = jnp.ones((N_FEATURES,), dtype=jnp.float32)
    beta = jnp.zeros((N_FEATURES,), dtype=jnp.float32)

    # Linear(100, 100) init: U(-1/sqrt(in), 1/sqrt(in)).
    bound = 1.0 / jnp.sqrt(jnp.float32(N_FEATURES))
    weight = jax.random.uniform(
        k_w, (N_FEATURES, N_FEATURES), minval=-bound, maxval=bound, dtype=jnp.float32
    )
    bias = jax.random.uniform(
        k_b, (N_FEATURES,), minval=-bound, maxval=bound, dtype=jnp.float32
    )

    # One-time parameter prep (not on the per-call path).
    params, wT = prepare_params(gamma, beta, weight, bias)
    params, wT = jax.block_until_ready((params, wT))

    out = model_forward(x, params, wT)
    jax.block_until_ready(out)

    # Sanity check against a pure-JAX f32 reference (training-mode BatchNorm).
    # Tolerance loosened to cover bf16 MXU operands (f32 accumulation keeps
    # the error ~1e-3 absolute).
    mean = jnp.mean(x, axis=0, keepdims=True)
    var = jnp.mean((x - mean) ** 2, axis=0, keepdims=True)
    ref = (x - mean) / jnp.sqrt(var + BN_EPS) * gamma + beta
    ref = jnp.maximum(ref @ weight.T + bias, 0.0)
    assert out.shape == (N, N_FEATURES)
    assert jnp.allclose(out, ref, atol=2e-2, rtol=2e-2), float(
        jnp.max(jnp.abs(out - ref))
    )

    print("KERNEL_OK")
</pallas_src>

<mosaic_0001>
module attributes {stable_mosaic.version = 11 : i64} {
  func.func @_fused_bn_linear_relu_kernel(%arg0: memref<8x100xf32, #tpu.memory_space<vmem>>, %arg1: memref<3x100xf32, #tpu.memory_space<vmem>>, %arg2: memref<128x128xbf16, #tpu.memory_space<vmem>>, %arg3: memref<8x100xf32, #tpu.memory_space<vmem>>, %arg4: memref<8x128xf32, #tpu.memory_space<vmem>>) attributes {dimension_semantics = [], scalar_prefetch = 0 : i64, scratch_operands = 1 : i64, tpu.core_type = #tpu.core_type<tc>} {
    %c0 = arith.constant 0 : index
    %c0_0 = arith.constant 0 : index
    %0 = vector.load %arg0[%c0, %c0_0] : memref<8x100xf32, #tpu.memory_space<vmem>>, vector<8x100xf32>
    %cst = arith.constant dense<0.000000e+00> : vector<100xf32>
    %1 = vector.multi_reduction <add>, %0, %cst [0] : vector<8x100xf32> to vector<100xf32>
    %2 = vector.shape_cast %1 : vector<100xf32> to vector<1x100xf32>
    %3 = arith.mulf %0, %0 : vector<8x100xf32>
    %cst_1 = arith.constant dense<0.000000e+00> : vector<100xf32>
    %4 = vector.multi_reduction <add>, %3, %cst_1 [0] : vector<8x100xf32> to vector<100xf32>
    %5 = vector.shape_cast %4 : vector<100xf32> to vector<1x100xf32>
    %cst_2 = arith.constant 1.250000e-01 : f32
    %6 = vector.broadcast %cst_2 : f32 to vector<1x100xf32>
    %7 = arith.mulf %2, %6 : vector<1x100xf32>
    %cst_3 = arith.constant 1.250000e-01 : f32
    %8 = vector.broadcast %cst_3 : f32 to vector<1x100xf32>
    %9 = arith.mulf %5, %8 : vector<1x100xf32>
    %10 = arith.mulf %7, %7 : vector<1x100xf32>
    %11 = arith.subf %9, %10 : vector<1x100xf32>
    %cst_4 = arith.constant 0.000000e+00 : f32
    %12 = vector.broadcast %cst_4 : f32 to vector<1x100xf32>
    %13 = arith.maximumf %11, %12 : vector<1x100xf32>
    %cst_5 = arith.constant 9.99999974E-6 : f32
    %14 = vector.broadcast %cst_5 : f32 to vector<1x100xf32>
    %15 = arith.addf %13, %14 : vector<1x100xf32>
    %16 = math.rsqrt %15 : vector<1x100xf32>
    %c0_6 = arith.constant 0 : index
    %c0_7 = arith.constant 0 : index
    %17 = vector.load %arg1[%c0_6, %c0_7] : memref<3x100xf32, #tpu.memory_space<vmem>>, vector<3x100xf32>
    %18 = vector.extract_strided_slice %17 {offsets = [0, 0], sizes = [1, 100], strides = [1, 1]} : vector<3x100xf32> to vector<1x100xf32>
    %19 = vector.extract_strided_slice %17 {offsets = [1, 0], sizes = [1, 100], strides = [1, 1]} : vector<3x100xf32> to vector<1x100xf32>
    %20 = vector.extract_strided_slice %17 {offsets = [2, 0], sizes = [1, 100], strides = [1, 1]} : vector<3x100xf32> to vector<1x100xf32>
    %21 = arith.mulf %18, %16 : vector<1x100xf32>
    %22 = arith.mulf %7, %21 : vector<1x100xf32>
    %23 = arith.subf %19, %22 : vector<1x100xf32>
    %cst_8 = arith.constant 0.000000e+00 : f32
    %24 = vector.broadcast %cst_8 : f32 to vector<8x128xf32>
    %c0_9 = arith.constant 0 : index
    %c0_10 = arith.constant 0 : index
    %25 = vector.load %arg4[%c0_9, %c0_10] : memref<8x128xf32, #tpu.memory_space<vmem>>, vector<8x128xf32>
    tpu.vector_store %arg4[%c0_9, %c0_10], %24 {strides = array<i32>} : memref<8x128xf32, #tpu.memory_space<vmem>>, vector<8x128xf32>,
    %26 = vector.broadcast %21 : vector<1x100xf32> to vector<8x100xf32>
    %27 = arith.mulf %0, %26 : vector<8x100xf32>
    %28 = vector.broadcast %23 : vector<1x100xf32> to vector<8x100xf32>
    %29 = arith.addf %27, %28 : vector<8x100xf32>
    %c0_11 = arith.constant 0 : index
    %c0_12 = arith.constant 0 : index
    %30 = vector.load %arg4[%c0_11, %c0_12] : memref<8x128xf32, #tpu.memory_space<vmem>>, vector<8x100xf32>
    tpu.vector_store %arg4[%c0_11, %c0_12], %29 {strides = array<i32>} : memref<8x128xf32, #tpu.memory_space<vmem>>, vector<8x100xf32>,
    %c0_13 = arith.constant 0 : index
    %c0_14 = arith.constant 0 : index
    %31 = vector.load %arg4[%c0_13, %c0_14] : memref<8x128xf32, #tpu.memory_space<vmem>>, vector<8x128xf32>
    %32 = arith.truncf %31 : vector<8x128xf32> to vector<8x128xbf16>
    %c0_15 = arith.constant 0 : index
    %c0_16 = arith.constant 0 : index
    %33 = vector.load %arg2[%c0_15, %c0_16] : memref<128x128xbf16, #tpu.memory_space<vmem>>, vector<128x128xbf16>
    %cst_17 = arith.constant dense<0.000000e+00> : vector<8x128xf32>
    %34 = tpu.matmul %32, %33, %cst_17 {dimension_numbers = #tpu.dot_dimension_numbers<[1], [0], [0], [1], [0, 0, 1, 1], [], []>} : vector<8x128xbf16>, vector<128x128xbf16>, vector<8x128xf32> -> vector<8x128xf32>
    %35 = vector.extract_strided_slice %34 {offsets = [0, 0], sizes = [8, 100], strides = [1, 1]} : vector<8x128xf32> to vector<8x100xf32>
    %36 = vector.broadcast %20 : vector<1x100xf32> to vector<8x100xf32>
    %37 = arith.addf %35, %36 : vector<8x100xf32>
    %cst_18 = arith.constant 0.000000e+00 : f32
    %38 = vector.broadcast %cst_18 : f32 to vector<8x100xf32>
    %39 = arith.maximumf %37, %38 : vector<8x100xf32>
    %c0_19 = arith.constant 0 : index
    %c0_20 = arith.constant 0 : index
    %40 = vector.load %arg3[%c0_19, %c0_20] : memref<8x100xf32, #tpu.memory_space<vmem>>, vector<8x100xf32>
    tpu.vector_store %arg3[%c0_19, %c0_20], %39 {strides = array<i32>} : memref<8x100xf32, #tpu.memory_space<vmem>>, vector<8x100xf32>,
    return
  }
}

</mosaic_0001>

<bundles_post_ra>
// kernel: model_forward.1
= control target key start
LH: loop header
LB: loop body
LE: loop exit
PB: predicated region body
PF: predicated region fallthrough
CT: control target
= control target key end

     0   :  { %8 = vsyncpa [#allocation4], 0  ;;  %s410_s0 = inlined_call_operand.hbm [shape: f32[8,100], index: 0, kind: input, shape index: {}]   ;;  %s411_s1 = inlined_call_operand.hbm [shape: f32[3,100], index: 1, kind: input, shape index: {}]   ;;  %s412_s2 = inlined_call_operand.hbm [shape: bf16[128,128], index: 2, kind: input, shape index: {}]   ;;  %s413_s3 = inlined_call_operand.hbm [shape: f32[8,100], index: 3, kind: output, shape index: {}]  }
   0x1   :  { %9 = vsyncpa [#allocation7], 0 }
   0x2   :  { %10 = vsyncpa [#allocation5], 0  ;;  %s366_s12 = smov [#allocation6]   ;;  %s367_s14 = smov [#allocation3]  }
   0x3   :  { %s27_s13 = sshll.u32 %s366_s12, 4  ;;  %s17_s15 = sshll.u32 %s367_s14, 4  ;;  %s28_s13 = int_to_ptr.vmem [resolvable:$true] %s27_s13  ;;  %s18_s15 = int_to_ptr.vmem [resolvable:$true] %s17_s15 }
   0x4   :  { %s288_s16 = scalar_lea.vmem %s28_s13, 64  ;;  %p293_p1 = scmp.lt.s32.totalorder %s28_s13, %s28_s13 }
   0x5   :  { %p289_p0 = scmp.ne.s32.totalorder %s28_s13, %s288_s16  ;;  %p294_p2 = scmp.lt.s32.totalorder %s288_s16, %s288_s16 }
   0x7   :  { %p295_p3 = por %p294_p2, %p293_p1 }
   0x9   :  { %p296_p4 = pnand %p295_p3, %p289_p0 }
   0xb   :  { %299 = shalt.err (!%p296_p4)
}
   0xc   :  { %30 = dma.hbm_to_vmem [thread:$0]  %s411_s1, 64, %s28_s13, [#allocation7]  }
   0xd   :  { %s308_s19 = scalar_lea.vmem %s18_s15, 128  ;;  %p313_p6 = scmp.lt.s32.totalorder %s18_s15, %s18_s15 }
   0xe   :  { %p309_p5 = scmp.ne.s32.totalorder %s18_s15, %s308_s19  ;;  %p314_p7 = scmp.lt.s32.totalorder %s308_s19, %s308_s19 }
  0x10   :  { %p315_p8 = por %p314_p7, %p313_p6 }
  0x12   :  { %p316_p9 = pnand %p315_p8, %p309_p5 }
  0x14   :  { %319 = shalt.err (!%p316_p9)
}
  0x15   :  { %20 = dma.hbm_to_vmem [thread:$0]  %s410_s0, 128, %s18_s15, [#allocation4]  }
  0x16   :  { %s368_s22 = smov [#allocation8]  }
  0x17   :  { %s36_s23 = sshll.u32 %s368_s22, 4  ;;  %s37_s23 = int_to_ptr.vmem [resolvable:$true] %s36_s23 }
  0x18   :  { %s328_s24 = scalar_lea.vmem %s37_s23, 1024  ;;  %p333_p11 = scmp.lt.s32.totalorder %s37_s23, %s37_s23 }
  0x19   :  { %p329_p10 = scmp.ne.s32.totalorder %s37_s23, %s328_s24  ;;  %p334_p12 = scmp.lt.s32.totalorder %s328_s24, %s328_s24 }
  0x1b   :  { %p335_p13 = por %p334_p12, %p333_p11 }
  0x1d   :  { %p336_p0 = pnand %p335_p13, %p329_p10 }
  0x1f   :  { %339 = shalt.err (!%p336_p0)
}
  0x20   :  { %s369_s1 = smov 64   ;;  %s370_s25 = smov 4  }
  0x21   :  { %42 = dma.hbm_to_vmem [thread:$0]  %s412_s2, 1024, %s37_s23, [#allocation7], %s369_s1, %s369_s1, %s370_s25  }
  0x22   :  { %360 = dma.done.wait [#allocation4], 128  }
  0x23   :  { %361 = vsyncadd [#allocation4], 4294967168 }
  0x24   :  { %362 = dma.done.wait [#allocation7], 1088  }
  0x25   :  { %363 = vsyncadd [#allocation7], 4294966208  ;;  %v371_v0 = vmov 0.0   ;;  %vm372_vm0 = vmmov 0   ;;  %v270_v1 = vld [vmem:[#allocation8 + $0x38] sm:$0xff]   ;;  %v271_v2 = vld [vmem:[#allocation8 + $0x30] sm:$0xff]   ;;  %v85_v31 = vlaneseq }
  0x26   :  { %242 = vmatprep.subr.bf16.mxu0 %v371_v0  ;;  %84 = vst [vmem:[#allocation2] sm:$0xff] %v371_v0  ;;  %258 = vmatprep.mubr.msk.bf16.mxu0 %vm372_vm0, %v371_v0  ;;  %v272_v3 = vld [vmem:[#allocation8 + $0x28] sm:$0xff]   ;;  %vm54_vm1 = vcmask 818176   ;;  %v53_v4 = vld [vmem:[#allocation3] sm:$0xff]  ;;  %v273_v7 = vld [vmem:[#allocation8 + $0x20] sm:$0xff]   ;;  %s373_s0 = smov [#allocation9]  }
  0x27   :  { %243 = vmatpush3.bf16.msra.mxu0 %v270_v1  ;;  %v55_v5 = vsel %vm54_vm1, %v53_v4, 0.0  ;;  %v62_v6 = vmul.f32 %v53_v4, %v53_v4  ;;  %v274_v12 = vld [vmem:[#allocation8 + $0x18] sm:$0xff]   ;;  %v275_v17 = vld [vmem:[#allocation8 + $0x10] sm:$0xff]   ;;  %v276_v22 = vld [vmem:[#allocation8 + $0x8] sm:$0xff]   ;;  %v86_v32 = vshrl.u32 %v85_v31, 7  ;;  %s215_s2 = sshll.u32 %s373_s0, 4  ;;  %s216_s2 = int_to_ptr.vmem [resolvable:$true] %s215_s2 }
  0x28   :  { %244 = vmatprep.subr.bf16.mxu0 %v371_v0  ;;  %v56_v8 = vrot.slane %v55_v5, 4  ;;  %v277_v27 = vld [vmem:[#allocation8] sm:$0xff]   ;;  %v77_v33 = vld [vmem:[#allocation6] sm:$0x7]  ;;  %s340_s28 = scalar_lea.vmem %s216_s2, 128  ;;  %p345_p2 = scmp.lt.s32.totalorder %s216_s2, %s216_s2 }
  0x29   :  { %v63_v9 = vsel %vm54_vm1, %v62_v6, 0.0  ;;  %v87_v34 = vsub.s32 0, %v86_v32  ;;  %v92_v40 = vsub.s32 1, %v86_v32  ;;  %v204_v47 = vsub.s32 2, %v86_v32  ;;  %p341_p1 = scmp.ne.s32.totalorder %s216_s2, %s340_s28  ;;  %p346_p3 = scmp.lt.s32.totalorder %s340_s28, %s340_s28 }
  0x2a   :  { %v57_v10 = vadd.f32 %v56_v8, %v55_v5  ;;  %v64_v11 = vrot.slane %v63_v9, 4 }
  0x2b   :  { %245 = vmatpush3.bf16.msra.mxu0 %v271_v2  ;;  %v205_v48 = vrot.slane %v77_v33, %v204_v47  ;;  %p347_p4 = por %p346_p3, %p345_p2 }
  0x2c   :  { %246 = vmatprep.subr.bf16.mxu0 %v371_v0  ;;  %v58_v13 = vrot.slane %v57_v10, 2  ;;  %v65_v14 = vadd.f32 %v64_v11, %v63_v9 }
  0x2d   :  { %p348_p5 = pnand %p347_p4, %p341_p1 }
  0x2e   :  { %v59_v15 = vadd.f32 %v58_v13, %v57_v10  ;;  %v66_v16 = vrot.slane %v65_v14, 2 }
  0x2f   :  { %247 = vmatpush3.bf16.msra.mxu0 %v272_v3 }
  0x30   :  { %248 = vmatprep.subr.bf16.mxu0 %v371_v0  ;;  %v60_v18 = vrot.slane %v59_v15, 1  ;;  %v67_v19 = vadd.f32 %v66_v16, %v65_v14 }
  0x32   :  { %v61_v20 = vadd.f32 %v60_v18, %v59_v15  ;;  %v68_v21 = vrot.slane %v67_v19, 1 }
  0x33   :  { %249 = vmatpush3.bf16.msra.mxu0 %v273_v7 }
  0x34   :  { %250 = vmatprep.subr.bf16.mxu0 %v371_v0  ;;  %v69_v23 = vadd.f32 %v68_v21, %v67_v19  ;;  %v70_v24 = vmul.f32 0.125, %v61_v20 }
  0x36   :  { %v71_v25 = vmul.f32 0.125, %v69_v23  ;;  %v72_v26 = vmul.f32 %v70_v24, %v70_v24 }
  0x37   :  { %251 = vmatpush3.bf16.msra.mxu0 %v274_v12 }
  0x38   :  { %252 = vmatprep.subr.bf16.mxu0 %v371_v0  ;;  %v73_v28 = vsub.f32 %v71_v25, %v72_v26 }
  0x3a   :  { %v74_v29 = vmax.f32 %v73_v28, 0.0 }
  0x3b   :  { %253 = vmatpush3.bf16.msra.mxu0 %v275_v17 }
  0x3c   :  { %254 = vmatprep.subr.bf16.mxu0 %v371_v0  ;;  %v75_v30 = vadd.f32 1e-05, %v74_v29 }
  0x3e   :  { %278 = vrsqrt.f32 %v75_v30 }
  0x3f   :  { %255 = vmatpush3.bf16.msra.mxu0 %v276_v22 }
  0x40   :  { %256 = vmatprep.subr.bf16.mxu0 %v371_v0 }
  0x43   :  { %257 = vmatpush3.bf16.msra.mxu0 %v277_v27 }
  0x4b   :  { %v279_v35 = vpop.eup %278 }
  0x4c   :  { %v78_v36 = vmul.f32 %v279_v35, %v77_v33 }
  0x4e   :  { %v79_v37 = vmul.f32 %v78_v36, %v70_v24  ;;  %v88_v38 = vrot.slane %v78_v36, %v87_v34 }
  0x50   :  { %v81_v39 = vrot.slane %v79_v37, 7  ;;  %v89_v42 = vmul.f32 %v88_v38, %v53_v4 }
  0x52   :  { %v83_v41 = vsub.f32 %v77_v33, %v81_v39 }
  0x54   :  { %v93_v43 = vrot.slane %v83_v41, %v92_v40 }
  0x56   :  { %v94_v44 = vadd.f32 %v93_v43, %v89_v42 }
  0x58   :  { %95 = vst.msk [vmem:[#allocation2] sm:$0xff] %vm54_vm1, %v94_v44 }
  0x5f   :  { %v96_v45 = vld [vmem:[#allocation2] sm:$0xff] }
  0x60   :  { %v97_v46 = vpack.c.bf16 %v96_v45, %v96_v45 }
  0x62   :  { %259 = vmatmul.mubr.bf16.vlgmr.msra.gmra.mxu0 %v97_v46 }
 0x122   :  { %v196_v49 = vpop.f32.mrf.mxu0 }
 0x123   :  { %v206_v50 = vadd.f32 %v205_v48, %v196_v49 }
 0x124   :  { %v260_v51 = vpop.f32.mrf.mxu0 }
 0x125   :  { %v207_v52 = vmax.f32 %v206_v50, 0.0 }
 0x126   :  { %v199_v53 = vpop.f32.mrf.mxu0 }
 0x127   :  { %208 = vst.msk [vmem:[#allocation9] sm:$0xff] %vm54_vm1, %v207_v52 }
 0x128   :  { %v261_v54 = vpop.f32.mrf.mxu0 }
 0x129   :  { %351 = shalt.err (!%p348_p5)
}
 0x12a   :  { %218 = dma.vmem_to_hbm [thread:$0]  %s216_s2, 128, %s413_s3, [#allocation5]  }
 0x12b   :  { %364 = dma.done.wait [#allocation5], 128  }
 0x12c   :  { %365 = vsyncadd [#allocation5], 4294967168 }
 0x12d   :  { %222 = vsyncpa [#allocation4], 1 }
 0x12e   :  { %223 = vsyncpa [#allocation7], 1 }
 0x12f   :  { %224 = vsyncpa [#allocation5], 1 }

</bundles_post_ra>
